<compile_context>
chip_gen: v5e
topology: v5e:2x2
jax: 0.10.0
libtpu: 0.0.40
codegen_flags: <defaults>
</compile_context>

<pallas_src>
import jax
import jax.numpy as jnp
from jax.experimental import pallas as pl
from jax.experimental.pallas import tpu as pltpu

K = 10                        # embedding dim (k in the PyTorch module)
H1, H2, OUT = 20, 8, 2        # hidden_layer = [4*k, 20, 8] -> Out(2)
N_USER = 138500
N_MOVIE = 131270

# Packed-bias layout (8-aligned sublane offsets inside one (BIAS_ROWS, 1) array)
B1_OFF, B2_OFF, B3_OFF = 0, 24, 32
BIAS_ROWS = 40


def din_kernel(fea_ref, w1_ref, w2_ref, w3_ref, bias_ref, o_ref):
    """One batch tile.

    fea_ref : (4K, TB)  activations, batch on lanes
    w1_ref  : (H1, 4K)  = W1^T          (resident across grid steps)
    w2_ref  : (H2, H1)  = W2^T          (resident)
    w3_ref  : (OUT, H2) = W3^T          (resident)
    bias_ref: (BIAS_ROWS, 1) packed [b1 | pad | b2 | b3 | pad]  (resident)
    o_ref   : (1, TB)   probability of class 1 per sample (lane-dense)
    """
    fea = fea_ref[...]                                   # (4K, TB)
    bias = bias_ref[...]                                 # (BIAS_ROWS, 1)
    b1 = bias[B1_OFF:B1_OFF + H1, :]                     # (H1, 1)
    b2 = bias[B2_OFF:B2_OFF + H2, :]                     # (H2, 1)
    b3 = bias[B3_OFF:B3_OFF + OUT, :]                    # (OUT, 1)

    # Linear_0 + ReLU:  (H1, 4K) @ (4K, TB) -> (H1, TB)
    h1 = jnp.dot(w1_ref[...], fea, preferred_element_type=jnp.float32) + b1
    h1 = jnp.maximum(h1, 0.0)

    # Linear_1 + ReLU:  (H2, H1) @ (H1, TB) -> (H2, TB)
    h2 = jnp.dot(w2_ref[...], h1, preferred_element_type=jnp.float32) + b2
    h2 = jnp.maximum(h2, 0.0)

    # Out:  (OUT, H2) @ (H2, TB) -> (OUT, TB)
    logits = jnp.dot(w3_ref[...], h2, preferred_element_type=jnp.float32) + b3

    # softmax([l0, l1])[1] == sigmoid(l1 - l0); compute it without cross-lane
    # reductions (exp + divide land on the otherwise-idle EUP slot).
    diff = logits[0:1, :] - logits[1:2, :]               # (1, TB) = l0 - l1
    p1 = 1.0 / (1.0 + jnp.exp(diff))
    o_ref[...] = p1.astype(o_ref.dtype)


def init_params(key):
    ks = jax.random.split(key, 10)
    # Embeddings ~ N(0, 1), matching nn.Embedding default.
    user = jax.random.normal(ks[0], (N_USER, K), jnp.float32)
    movie = jax.random.normal(ks[1], (N_MOVIE, K), jnp.float32)
    movie_cate = jax.random.normal(ks[2], (N_USER, K), jnp.float32)
    # Defined in the PyTorch module but never used in forward.
    user_rate_emb = jax.random.normal(ks[3], (N_MOVIE, K), jnp.float32)

    def linear(kw, kb, fan_in, fan_out):
        bound = 1.0 / jnp.sqrt(fan_in)
        w = jax.random.uniform(kw, (fan_in, fan_out), jnp.float32, -bound, bound)
        b = jax.random.uniform(kb, (fan_out,), jnp.float32, -bound, bound)
        return w, b

    w1, b1 = linear(ks[4], ks[5], 4 * K, H1)
    w2, b2 = linear(ks[6], ks[7], H1, H2)
    w3, b3 = linear(ks[8], ks[9], H2, OUT)
    return dict(user=user, movie=movie, movie_cate=movie_cate,
                user_rate_emb=user_rate_emb,
                w1=w1, b1=b1, w2=w2, b2=b2, w3=w3, b3=b3)


def din_forward(params, user_ids, movie_ids, movie_cate, user_rate, *, tb=128):
    """Batched forward: per-sample semantics identical to the PyTorch module."""
    B = user_ids.shape[0]
    assert B % tb == 0, (B, tb)
    num_tiles = B // tb

    # --- embedding gathers + mean-pooling (bulk XLA glue) ---
    a = params["user"][user_ids]                          # (B, K)
    b = params["movie"][movie_ids]                        # (B, K)
    c = params["movie_cate"][movie_cate].mean(axis=1)     # (B, Lc, K) -> (B, K)
    # NOTE: reproduces the PyTorch module's bug: user_rate is looked up in the
    # movie_cate embedding table, not the user_rate table.
    d = params["movie_cate"][user_rate].mean(axis=1)      # (B, Ld, K) -> (B, K)

    # fea with batch on the lane axis: (4K, B)
    fea_t = jnp.concatenate([a, b, c, d], axis=1).T       # (4K, B)

    # Transposed weights + packed biases (resident VMEM blocks).
    w1t = params["w1"].T                                  # (H1, 4K)
    w2t = params["w2"].T                                  # (H2, H1)
    w3t = params["w3"].T                                  # (OUT, H2)
    bias_pack = jnp.zeros((BIAS_ROWS, 1), jnp.float32)
    bias_pack = bias_pack.at[B1_OFF:B1_OFF + H1, 0].set(params["b1"])
    bias_pack = bias_pack.at[B2_OFF:B2_OFF + H2, 0].set(params["b2"])
    bias_pack = bias_pack.at[B3_OFF:B3_OFF + OUT, 0].set(params["b3"])

    const = lambda i: (0, 0)   # weights/biases: same block every grid step
    out = pl.pallas_call(
        din_kernel,
        out_shape=jax.ShapeDtypeStruct((1, B), jnp.float32),
        grid=(num_tiles,),
        in_specs=[
            pl.BlockSpec((4 * K, tb), lambda i: (0, i)),      # activations
            pl.BlockSpec((H1, 4 * K), const),                 # W1^T (resident)
            pl.BlockSpec((H2, H1), const),                    # W2^T (resident)
            pl.BlockSpec((OUT, H2), const),                   # W3^T (resident)
            pl.BlockSpec((BIAS_ROWS, 1), const),              # biases (resident)
        ],
        out_specs=pl.BlockSpec((1, tb), lambda i: (0, i)),    # lane-dense output
        compiler_params=pltpu.CompilerParams(
            dimension_semantics=("parallel",)),
    )(fea_t, w1t, w2t, w3t, bias_pack)
    return out.reshape(B)


def din_ref(params, user_ids, movie_ids, movie_cate, user_rate):
    """Pure-JAX reference mirroring the PyTorch forward exactly (per sample)."""
    def one(uid, mid, mc, ur):
        a = params["user"][uid].reshape(-1)
        b = params["movie"][mid].reshape(-1)
        c = params["movie_cate"][mc].sum(0) / mc.shape[0]
        d = params["movie_cate"][ur].sum(0) / ur.shape[0]
        fea = jnp.concatenate([a, b, c, d])
        h1 = jnp.maximum(fea @ params["w1"] + params["b1"], 0.0)
        h2 = jnp.maximum(h1 @ params["w2"] + params["b2"], 0.0)
        logits = h2 @ params["w3"] + params["b3"]
        res = jax.nn.softmax(logits, axis=0)
        return res[1]
    return jax.vmap(one)(user_ids, movie_ids, movie_cate, user_rate)


if __name__ == "__main__":
    key = jax.random.PRNGKey(0)
    pkey, ikey = jax.random.split(key)
    params = init_params(pkey)

    # Batched example: 256 samples (2 grid tiles of 128), history length 8.
    B, L = 256, 8
    k1, k2, k3, k4 = jax.random.split(ikey, 4)
    user_ids = jax.random.randint(k1, (B,), 0, N_USER)
    movie_ids = jax.random.randint(k2, (B,), 0, N_MOVIE)
    movie_cate = jax.random.randint(k3, (B, L), 0, N_USER)
    user_rate = jax.random.randint(k4, (B, L), 0, N_MOVIE)

    fwd = jax.jit(din_forward)
    out = jax.block_until_ready(fwd(params, user_ids, movie_ids, movie_cate, user_rate))
    ref = jax.block_until_ready(din_ref(params, user_ids, movie_ids, movie_cate, user_rate))

    assert out.shape == (B,), out.shape
    assert jnp.allclose(out, ref, atol=2e-5, rtol=1e-4), (out[:4], ref[:4])
    print("KERNEL_OK")
</pallas_src>

<mosaic_0001>
module attributes {stable_mosaic.version = 11 : i64} {
  func.func @din_kernel(%arg0: i32, %arg1: memref<40x128xf32, #tpu.memory_space<vmem>>, %arg2: memref<20x40xf32, #tpu.memory_space<vmem>>, %arg3: memref<8x20xf32, #tpu.memory_space<vmem>>, %arg4: memref<2x8xf32, #tpu.memory_space<vmem>>, %arg5: memref<40x1xf32, #tpu.memory_space<vmem>>, %arg6: memref<1x128xf32, #tpu.memory_space<vmem>>) attributes {dimension_semantics = [#tpu.dimension_semantics<parallel>], iteration_bounds = array<i64: 2>, scalar_prefetch = 0 : i64, scratch_operands = 0 : i64, tpu.core_type = #tpu.core_type<tc>, window_params = [{transform_indices = @transform_0, window_bounds = array<i64: 40, 128>}, {pipeline_mode = #tpu.pipeline_mode<synchronous>, transform_indices = @transform_1, window_bounds = array<i64: 20, 40>}, {pipeline_mode = #tpu.pipeline_mode<synchronous>, transform_indices = @transform_2, window_bounds = array<i64: 8, 20>}, {pipeline_mode = #tpu.pipeline_mode<synchronous>, transform_indices = @transform_3, window_bounds = array<i64: 2, 8>}, {pipeline_mode = #tpu.pipeline_mode<synchronous>, transform_indices = @transform_4, window_bounds = array<i64: 40, 1>}, {transform_indices = @transform_5, window_bounds = array<i64: 1, 128>}]} {
    %c0 = arith.constant 0 : index
    %c0_0 = arith.constant 0 : index
    %0 = vector.load %arg1[%c0, %c0_0] : memref<40x128xf32, #tpu.memory_space<vmem>>, vector<40x128xf32>
    %c0_1 = arith.constant 0 : index
    %c0_2 = arith.constant 0 : index
    %1 = vector.load %arg5[%c0_1, %c0_2] : memref<40x1xf32, #tpu.memory_space<vmem>>, vector<40x1xf32>
    %2 = vector.extract_strided_slice %1 {offsets = [0, 0], sizes = [20, 1], strides = [1, 1]} : vector<40x1xf32> to vector<20x1xf32>
    %3 = vector.extract_strided_slice %1 {offsets = [24, 0], sizes = [8, 1], strides = [1, 1]} : vector<40x1xf32> to vector<8x1xf32>
    %4 = vector.extract_strided_slice %1 {offsets = [32, 0], sizes = [2, 1], strides = [1, 1]} : vector<40x1xf32> to vector<2x1xf32>
    %c0_3 = arith.constant 0 : index
    %c0_4 = arith.constant 0 : index
    %5 = vector.load %arg2[%c0_3, %c0_4] : memref<20x40xf32, #tpu.memory_space<vmem>>, vector<20x40xf32>
    %cst = arith.constant dense<0.000000e+00> : vector<20x128xf32>
    %6 = tpu.matmul %5, %0, %cst {dimension_numbers = #tpu.dot_dimension_numbers<[1], [0], [0], [1], [0, 0, 1, 1], [], []>} : vector<20x40xf32>, vector<40x128xf32>, vector<20x128xf32> -> vector<20x128xf32>
    %7 = vector.broadcast %2 : vector<20x1xf32> to vector<20x128xf32>
    %8 = arith.addf %6, %7 : vector<20x128xf32>
    %cst_5 = arith.constant 0.000000e+00 : f32
    %9 = vector.broadcast %cst_5 : f32 to vector<20x128xf32>
    %10 = arith.maximumf %8, %9 : vector<20x128xf32>
    %c0_6 = arith.constant 0 : index
    %c0_7 = arith.constant 0 : index
    %11 = vector.load %arg3[%c0_6, %c0_7] : memref<8x20xf32, #tpu.memory_space<vmem>>, vector<8x20xf32>
    %cst_8 = arith.constant dense<0.000000e+00> : vector<8x128xf32>
    %12 = tpu.matmul %11, %10, %cst_8 {dimension_numbers = #tpu.dot_dimension_numbers<[1], [0], [0], [1], [0, 0, 1, 1], [], []>} : vector<8x20xf32>, vector<20x128xf32>, vector<8x128xf32> -> vector<8x128xf32>
    %13 = vector.broadcast %3 : vector<8x1xf32> to vector<8x128xf32>
    %14 = arith.addf %12, %13 : vector<8x128xf32>
    %cst_9 = arith.constant 0.000000e+00 : f32
    %15 = vector.broadcast %cst_9 : f32 to vector<8x128xf32>
    %16 = arith.maximumf %14, %15 : vector<8x128xf32>
    %c0_10 = arith.constant 0 : index
    %c0_11 = arith.constant 0 : index
    %17 = vector.load %arg4[%c0_10, %c0_11] : memref<2x8xf32, #tpu.memory_space<vmem>>, vector<2x8xf32>
    %cst_12 = arith.constant dense<0.000000e+00> : vector<2x128xf32>
    %18 = tpu.matmul %17, %16, %cst_12 {dimension_numbers = #tpu.dot_dimension_numbers<[1], [0], [0], [1], [0, 0, 1, 1], [], []>} : vector<2x8xf32>, vector<8x128xf32>, vector<2x128xf32> -> vector<2x128xf32>
    %19 = vector.broadcast %4 : vector<2x1xf32> to vector<2x128xf32>
    %20 = arith.addf %18, %19 : vector<2x128xf32>
    %21 = vector.extract_strided_slice %20 {offsets = [0, 0], sizes = [1, 128], strides = [1, 1]} : vector<2x128xf32> to vector<1x128xf32>
    %22 = vector.extract_strided_slice %20 {offsets = [1, 0], sizes = [1, 128], strides = [1, 1]} : vector<2x128xf32> to vector<1x128xf32>
    %23 = arith.subf %21, %22 : vector<1x128xf32>
    %24 = math.exp %23 : vector<1x128xf32>
    %cst_13 = arith.constant 1.000000e+00 : f32
    %25 = vector.broadcast %cst_13 : f32 to vector<1x128xf32>
    %26 = arith.addf %25, %24 : vector<1x128xf32>
    %cst_14 = arith.constant 1.000000e+00 : f32
    %27 = vector.broadcast %cst_14 : f32 to vector<1x128xf32>
    %28 = arith.divf %27, %26 : vector<1x128xf32>
    %c0_15 = arith.constant 0 : index
    %c0_16 = arith.constant 0 : index
    %29 = vector.load %arg6[%c0_15, %c0_16] : memref<1x128xf32, #tpu.memory_space<vmem>>, vector<1x128xf32>
    tpu.vector_store %arg6[%c0_15, %c0_16], %28 {strides = array<i32>} : memref<1x128xf32, #tpu.memory_space<vmem>>, vector<1x128xf32>,
    return
  }
  func.func @transform_0(%arg0: i32) -> (i32, i32) {
    %c0_i32 = arith.constant 0 : i32
    %c0_i32_0 = arith.constant 0 : i32
    return %c0_i32, %arg0 : i32, i32
  }
  func.func @transform_1(%arg0: i32) -> (i32, i32) {
    %c0_i32 = arith.constant 0 : i32
    %c0_i32_0 = arith.constant 0 : i32
    %c0_i32_1 = arith.constant 0 : i32
    return %c0_i32, %c0_i32_0 : i32, i32
  }
  func.func @transform_2(%arg0: i32) -> (i32, i32) {
    %c0_i32 = arith.constant 0 : i32
    %c0_i32_0 = arith.constant 0 : i32
    %c0_i32_1 = arith.constant 0 : i32
    return %c0_i32, %c0_i32_0 : i32, i32
  }
  func.func @transform_3(%arg0: i32) -> (i32, i32) {
    %c0_i32 = arith.constant 0 : i32
    %c0_i32_0 = arith.constant 0 : i32
    %c0_i32_1 = arith.constant 0 : i32
    return %c0_i32, %c0_i32_0 : i32, i32
  }
  func.func @transform_4(%arg0: i32) -> (i32, i32) {
    %c0_i32 = arith.constant 0 : i32
    %c0_i32_0 = arith.constant 0 : i32
    %c0_i32_1 = arith.constant 0 : i32
    return %c0_i32, %c0_i32_0 : i32, i32
  }
  func.func @transform_5(%arg0: i32) -> (i32, i32) {
    %c0_i32 = arith.constant 0 : i32
    %c0_i32_0 = arith.constant 0 : i32
    return %c0_i32, %arg0 : i32, i32
  }
}

</mosaic_0001>

<bundles_post_ra>
// kernel: din_forward.1
= control target key start
LH: loop header
LB: loop body
LE: loop exit
PB: predicated region body
PF: predicated region fallthrough
CT: control target
= control target key end

     0   :  { %10 = vsyncpa [#allocation4], 0  ;;  %s789_s0 = inlined_call_operand.vmem [shape: f32[40,256], index: 0, kind: input, shape index: {}]   ;;  %s790_s1 = inlined_call_operand.vmem [shape: f32[20,40], index: 1, kind: input, shape index: {}]   ;;  %s791_s2 = inlined_call_operand.vmem [shape: f32[8,20], index: 2, kind: input, shape index: {}]   ;;  %s792_s3 = inlined_call_operand.vmem [shape: f32[2,8], index: 3, kind: input, shape index: {}]   ;;  %s793_s4 = inlined_call_operand.vmem [shape: f32[40,1], index: 4, kind: input, shape index: {}]   ;;  %s794_s5 = inlined_call_operand.hbm [shape: f32[1,256], index: 5, kind: output, shape index: {}]  }
   0x1   :  { %12 = vsyncpa [#allocation4 + $0x1], 0  ;;  %s664_s18 = smov 0   ;;  %s666_s19 = smov 0  }
   0x2   :  { %s668_s20 = smov 0   ;;  %s670_s21 = smov 0  }
   0x3 LB: > { %s501_s22 = sadd.s32 4294967295, %s631_s21   ;;  %s502_s23 = sadd.s32 4294967294, %s631_s21   ;;  %s631_s21 = sphi %s670_s21, %s800_s21   ;;  %s627_s20 = sphi %s668_s20, %s799_s20   ;;  %s623_s19 = sphi %s666_s19, %s798_s19   ;;  %s619_s18 = sphi %s664_s18, %s797_s18  }
   0x4   : > { %s687_s24 = sadd.s32 1, %s631_s21   ;;  %s25_s25 = sadd.s32 1, %s627_s20 }
   0x5   : > { %s22_s26 = ssub.s32 %s631_s21, %s687_s24  ;;  %p32_p0 = scmp.ne.s32.totalorder %s627_s20, %s623_s19 }
   0x6   : > { %p23_p1 = scmp.eq.s32.totalorder %s22_s26, 0  ;;  %p33_p2 = scmp.eq.s32.totalorder %s631_s21, 0 }
   0x7   : > { %p146_p3 = scmp.eq.s32.totalorder %s501_s22, 1  ;;  %p151_p4 = scmp.ne.s32.totalorder %s623_s19, %s619_s18 }
   0x8   : > { %s700_s27 = scalar_select %p23_p1, %s627_s20, %s25_s25  }
   0x9   : > { %p34_p5 = por %p33_p2, %p32_p0  ;;  %p702_p6 = por %p146_p3, %p32_p0 }
   0xa   : > { %p152_p7 = scmp.eq.s32.totalorder %s502_s23, 1  ;;  %p504_p9 = scmp.ge.s32.totalorder %s631_s21, 2 }
   0xc   : > { %p706_p8 = por %p152_p7, %p151_p4  ;;  %180 = sbr.rel (%p504_p9) target bundleno = 26 (0x1a), region = 32 }
  0x11   : > { %183 = sbr.rel (!%p34_p5) target bundleno = 26 (0x1a), region = 36  ;;  %s185_s30 = sand.u32 (%p34_p5), 1, %s627_s20  }
  0x12   : > { %s505_s6 = sshll.u32 (%p34_p5), %s631_s21, 3  ;;  %s520_s7 = smul.u32 (%p34_p5), 40, %s185_s30 }
  0x13   : > { %s189_s10 = scalar_lea.vmem (%p34_p5), %s789_s0, %s505_s6 }
  0x14   : > { %v226_v0 = vld [vmem:[%s189_s10] sm:$0xff] (%p34_p5)  ;;  %v228_v1 = vld [vmem:[%s189_s10 + $0x10] sm:$0xff] (%p34_p5)  ;;  %s187_s11 = scalar_lea.vmem (%p34_p5), [#allocation2], %s520_s7 }
  0x15   : > { %v230_v2 = vld [vmem:[%s189_s10 + $0x20] sm:$0xff] (%p34_p5)  ;;  %227 = vst [vmem:[%s187_s11] sm:$0xff] (%p34_p5), %v226_v0  ;;  %v232_v3 = vld [vmem:[%s189_s10 + $0x30] sm:$0xff] (%p34_p5) }
  0x16   : > { %229 = vst [vmem:[%s187_s11 + $0x8] sm:$0xff] %v228_v1  ;;  %v234_v4 = vld [vmem:[%s189_s10 + $0x40] sm:$0xff] }
  0x17   : > { %231 = vst [vmem:[%s187_s11 + $0x10] sm:$0xff] %v230_v2 }
  0x18   : > { %233 = vst [vmem:[%s187_s11 + $0x18] sm:$0xff] %v232_v3 }
  0x19   : > { %235 = vst [vmem:[%s187_s11 + $0x20] sm:$0xff] %v234_v4 }
  0x1a PF: > { %p506_p10 = scmp.ge.s32.totalorder %s631_s21, 1  ;;  %p240_p11 = scmp.lt.s32.totalorder %s631_s21, 3 }
  0x1c   : > { %p241_p12 = pnand %p506_p10, %p240_p11 }
  0x1d   : > { %s721_s12 = sand.u32 (!%p241_p12), 1, %s623_s19   ;;  %s437_s6 = scalar_lea.hbm (!%p241_p12), %s794_s5, %s501_s22 }
  0x1e   : > { %244 = sbr.rel (%p241_p12) target bundleno = 496 (0x1f0), region = 74  ;;  %s272_s7 = scalar_lea.vmem (!%p241_p12), [#allocation3], %s721_s12 }
  0x1f   : > { %s521_s13 = smul.u32 (!%p241_p12), 40, %s721_s12  ;;  %s439_s8 = sshll.u32 (!%p241_p12), %s272_s7, 4  ;;  %s440_s8 = int_to_ptr.vmem [resolvable:$true] %s439_s8 }
  0x20   : > { %s441_s9 = sshll.u32 (!%p241_p12), %s437_s6, 4  ;;  %s429_s22 = scalar_lea.sflag (!%p241_p12), [#allocation4], %s721_s12  ;;  %s442_s9 = int_to_ptr.hbm [resolvable:$true] %s441_s9 }
  0x21   : > { %s249_s23 = scalar_lea.vmem (!%p241_p12), [#allocation2], %s521_s13  ;;  %s583_s10 = sshra.s32 (!%p241_p12), %s442_s9, 4  ;;  %s584_s10 = int_to_ptr.hbm [resolvable:$true] %s583_s10 }
  0x22   : > { %s585_s11 = scalar_lea.hbm (!%p241_p12), %s584_s10, 1  ;;  %s589_s15 = scalar_lea.hbm (!%p241_p12), %s794_s5, 2 }
  0x23   : > { %v633_v5 = vmov 0   ;;  %v280_v6 = vld [vmem:[%s793_s4 + $0x10] sm:$0xff]  ;;  %v278_v7 = vld [vmem:[%s793_s4] sm:$0xff]  ;;  %v279_v11 = vld [vmem:[%s793_s4 + $0x8] sm:$0xff]  ;;  %vm301_vm0 = vcmask 326656   ;;  %vm350_vm1 = vcmask 1043456   ;;  %p586_p13 = scmp.ne.s32.totalorder %s584_s10, %s585_s11  ;;  %p590_p2 = scmp.lt.s32.totalorder %s584_s10, %s794_s5 }
  0x24   : > { %562 = vset.pattern.permute.xlu0 %v633_v5  ;;  %563 = vset.pattern.permute.xlu1 %v633_v5  ;;  %v277_v8 = vld [vmem:[%s249_s23 + $0x20] sm:$0xff]  ;;  %v276_v9 = vld [vmem:[%s249_s23 + $0x18] sm:$0xff]  ;;  %v275_v10 = vld [vmem:[%s249_s23 + $0x10] sm:$0xff]  ;;  %vm346_vm2 = vcmask 162816   ;;  %vm381_vm3 = vcmask 64512   ;;  %p591_p3 = scmp.lt.s32.totalorder %s589_s15, %s585_s11 }
  0x25   : > { %298 = vperm.xlu0 %562, %v280_v6   ;;  %564 = vset.pattern.permute.xlu2 %v633_v5  ;;  %v274_v12 = vld [vmem:[%s249_s23 + $0x8] sm:$0xff]  ;;  %v281_v13 = vld [vmem:[%s793_s4 + $0x18] sm:$0xff]  ;;  %v273_v14 = vld [vmem:[%s249_s23] sm:$0xff]  ;;  %p587_p0 = pnand %p586_p13, %p702_p6 }
  0x26   : > { %288 = vperm.xlu1 %563, %v278_v7   ;;  %515 = vmatpush.msra.mxu3 %v277_v8  ;;  %v284_v15 = vld [vmem:[%s790_s1 + $0x8] sm:$0xff]  ;;  %v283_v16 = vld [vmem:[%s790_s1] sm:$0xff]  ;;  %v285_v17 = vld [vmem:[%s790_s1 + $0x10] sm:$0xf]  ;;  %p592_p4 = por %p591_p3, %p590_p2 }
  0x27   : > { %322 = vmatpush.msra.mxu0 %v277_v8  ;;  %v340_v30 = vld [vmem:[%s791_s2] sm:$0xff]  ;;  %p588_p1 = pneg %p587_p0 }
  0x28   : > { %516 = vmatpush.msra.mxu3 %v276_v9  ;;  %v282_v31 = vld [vmem:[%s793_s4 + $0x20] sm:$0xff] }
  0x29   : > { %323 = vmatpush.msra.mxu0 %v276_v9  ;;  %378 = vperm.xlu2 %564, %v282_v31   ;;  %v375_v36 = vld [vmem:[%s792_s3] sm:$0x3]  ;;  %p593_p5 = pnand %p592_p4, %p588_p1 }
  0x2a   : > { %517 = vmatpush.msra.mxu3 %v275_v10 }
  0x2b   : > { %324 = vmatpush.msra.mxu0 %v275_v10 }
  0x2c   : > { %518 = vmatpush.msra.mxu3 %v274_v12 }
  0x2d   : > { %293 = vperm.xlu0 %562, %v279_v11   ;;  %325 = vmatpush.msra.mxu0 %v274_v12 }
  0x2e   : > { %343 = vperm.xlu1 %563, %v281_v13   ;;  %519 = vmatpush.msra.mxu3 %v273_v14 }
  0x2f   : > { %326 = vmatpush.msra.mxu0 %v273_v14  ;;  %508 = vmatmul.msk.f32.vlgmr.msra.gmra.mxu3 %vm301_vm0, %v284_v15 }
  0x30   : > { %507 = vmatmul.msk.f32.vlgmr.msra.gmra.mxu0 %vm301_vm0, %v283_v16 }
  0x37   : > { %509 = vmatmul.msk.f32.gmra.mxu3 %vm301_vm0, %v285_v17 }
  0x83   : > { %v379_v37 = vpop.permute.xlu2 %378 }
  0x97   : > { %v299_v18 = vpop.permute.xlu0 %298 }
  0x98   : > { %v289_v22 = vpop.permute.xlu1 %288 }
  0x9f   : > { %v294_v20 = vpop.permute.xlu0 %293 }
  0xa0   : > { %v344_v32 = vpop.permute.xlu1 %343 }
  0xad   : > { %v328_v21 = vpop.f32.mrf.mxu0 }
  0xae   : > { %v329_v26 = vadd.f32 %v328_v21, %v289_v22 }
  0xb0   : > { %v337_v29 = vmax.f32 %v329_v26, 0.0 }
  0xb2   : > { %v331_v19 = vpop.f32.mrf.mxu3 }
  0xb3   : > { %v332_v24 = vadd.f32 %v331_v19, %v294_v20 }
  0xb5   : > { %v338_v28 = vmax.f32 %v332_v24, 0.0 }
  0xba   : > { %v334_v23 = vpop.f32.mrf.mxu3 }
  0xbb   : > { %v335_v25 = vadd.f32 %v334_v23, %v299_v18 }
  0xbd   : > { %v339_v27 = vmax.f32 %v335_v25, 0.0 }
  0xbf   : > { %510 = vmatpush.msk.msra.mxu1 %vm350_vm1, %v339_v27 }
  0xc1   : > { %368 = vmatpush.msra.mxu1 %v338_v28 }
  0xc3   : > { %369 = vmatpush.msra.mxu1 %v337_v29 }
  0xc4   : > { %511 = vmatmul.msk.f32.vlgmr.msra.gmra.mxu1 %vm346_vm2, %v340_v30 }
 0x141   : > { %v371_v33 = vpop.f32.mrf.mxu1 }
 0x142   : > { %v372_v34 = vadd.f32 %v371_v33, %v344_v32 }
 0x144   : > { %v374_v35 = vmax.f32 %v372_v34, 0.0 }
 0x146   : > { %400 = vmatpush.msra.mxu2 %v374_v35 }
 0x147   : > { %512 = vmatmul.msk.f32.vlgmr.msra.gmra.mxu2 %vm381_vm3, %v375_v36 }
 0x1ca   : > { %v402_v38 = vpop.f32.mrf.mxu2 }
 0x1cb   : > { %v403_v39 = vadd.f32 %v402_v38, %v379_v37 }
 0x1cd   : > { %v406_v40 = vrot.slane %v403_v39, 1 }
 0x1cf   : > { %v408_v41 = vsub.f32 %v403_v39, %v406_v40 }
 0x1d1   : > { %v409_v42 = vmul.f32 1.442695, %v408_v41 }
 0x1d3   : > { %565 = vpow2.f32 %v409_v42 }
 0x1d9   : > { %v566_v43 = vpop.eup %565 }
 0x1da   : > { %v411_v44 = vadd.f32 1.0, %v566_v43 }
 0x1dc   : > { %567 = vrcp.f32 %v411_v44  ;;  %v423_v48 = vand.u32 2147483648, %v411_v44  ;;  %v421_v50 = vand.u32 2147483647, %v411_v44  ;;  %vm417_vm5 = vweird.f32 %v411_v44 }
 0x1de   : > { %v424_v52 = vor.u32 1.1754944e-38, %v423_v48  ;;  %vm422_vm7 = vcmp.eq.f32.partialorder %v421_v50, 8.507059e+37 }
 0x1e2   : > { %v568_v45 = vpop.eup %567 }
 0x1e3   : > { %v413_v46 = vmul.f32 %v568_v45, %v411_v44  ;;  %vm418_vm4 = vweird.f32 %v568_v45 }
 0x1e4   : > { %vm419_vm6 = vmor %vm417_vm5, %vm418_vm4 }
 0x1e5   : > { %v414_v47 = vsub.f32 1.0, %v413_v46 }
 0x1e7   : > { %v415_v49 = vmul.f32 %v568_v45, %v414_v47 }
 0x1e9   : > { %v416_v51 = vadd.f32 %v568_v45, %v415_v49 }
 0x1eb   : > { %v420_v53 = vsel %vm419_vm6, %v568_v45, %v416_v51 }
 0x1ec   : > { %v425_v54 = vsel %vm422_vm7, %v424_v52, %v420_v53 }
 0x1ed   : > { %427 = vst [vmem:[%s272_s7] sm:$0x1] %v425_v54 }
 0x1ee   : > { %596 = shalt.err (!%p593_p5)
}
 0x1ef   : > { %522 = dma.vmem_to_hbm [thread:$0]  (%p702_p6), %s440_s8, 16, %s442_s9, %s429_s22  }
 0x1f0 PF: > { %s453_s12 = sand.u32 1, %s619_s18   ;;  %p525_p7 = pnand %p504_p9, %p706_p8 }
 0x1f1   : > { %s454_s23 = scalar_lea.sflag [#allocation4], %s453_s12 }
 0x1f2   : > { %p526_p10 = pneg %p525_p7 }
 0x1f4   : > { %614 = dma.done.wait (%p526_p10), %s454_s23, 16  }
 0x1f5   : > { %616 = vsyncadd (%p526_p10), %s454_s23, 4294967280  ;;  %p15_p11 = scmp.ge.s32.totalorder %s687_s24, 4   ;;  %s797_s18 = smov %s623_s19 }
 0x1f6   : > { %s798_s19 = smov %s627_s20  ;;  %s799_s20 = smov %s700_s27 }
 0x1f7   : > { %s800_s21 = smov %s687_s24  ;;  %17 = sbr.rel (!%p15_p11) target bundleno = 3 (0x3), region = 118 }
 0x1fc   :  { %459 = vsyncpa [#allocation4], 1 }
 0x1fd   :  { %461 = vsyncpa [#allocation4 + $0x1], 1 }

</bundles_post_ra>
